<compile_context>
chip_gen: v7x
topology: tpu7x:2x2x1
jax: 0.10.0
libtpu: 0.0.40
codegen_flags: <defaults>
</compile_context>

<pallas_src>
import functools

import jax
import jax.numpy as jnp
from jax.experimental import pallas as pl
from jax.experimental.pallas import tpu as pltpu


def _online_contrastive_kernel(margin, b_valid,
                               emb_r_ref, emb_c_ref,
                               nr_ref, nc_ref,
                               lab_r_ref, lab_c_ref,
                               out_ref):
    """One (tm, tn) block of the pair matrix; accumulates a partial loss sum."""
    i = pl.program_id(0)          # row-block index  (parallel)
    j = pl.program_id(1)          # col-block index  (arbitrary / reduction)

    tm = emb_r_ref.shape[0]
    tn = emb_c_ref.shape[0]

    # Initialize the per-row-block accumulator at the first column block.
    @pl.when(j == 0)
    def _():
        out_ref[...] = jnp.zeros_like(out_ref)

    # Strictly-upper-triangular pair structure => blocks with j < i contain no
    # selected pairs; skip all MXU/VPU/EUP work for them (their column DMAs
    # are also elided via the clamped index_maps in the wrapper).
    @pl.when(j >= i)
    def _():
        er = emb_r_ref[...]                           # (tm, D) input dtype
        ec = emb_c_ref[...]                           # (tn, D) input dtype

        # Gram block on the MXU: <e_i, e_j> contracting the feature axis.
        g = jax.lax.dot_general(
            er, ec, (((1,), (1,)), ((), ())),
            preferred_element_type=jnp.float32)       # (tm, tn)

        n_row = nr_ref[...]                           # (tm, 1)  f32
        n_col = nc_ref[...]                           # (1, tn)  f32

        # ||e_i - e_j||^2 = ||e_i||^2 + ||e_j||^2 - 2 <e_i, e_j>  (f32 math)
        d2 = jnp.maximum(n_row + n_col - 2.0 * g, 0.0)             # (tm, tn)

        # Build pair masks in-kernel: strict upper triangle, valid (unpadded)
        # columns.  (col > row) & (col < B)  =>  row < B automatically.
        row_g = i * tm + jax.lax.broadcasted_iota(jnp.int32, (tm, tn), 0)
        col_g = j * tn + jax.lax.broadcasted_iota(jnp.int32, (tm, tn), 1)
        pair_ok = (col_g > row_g) & (col_g < b_valid)

        same = lab_r_ref[...] == lab_c_ref[...]        # (tm,1) vs (1,tn) -> (tm,tn)
        pos = pair_ok & same
        neg = pair_ok & jnp.logical_not(same)

        # positive_loss = d2 ;  negative_loss = relu(margin - sqrt(d2))^2
        hinge = jnp.maximum(margin - jnp.sqrt(d2), 0.0)
        loss_blk = jnp.where(pos, d2, 0.0) + jnp.where(neg, hinge * hinge, 0.0)

        partial = jnp.sum(loss_blk)                    # scalar for this block
        out_ref[...] = out_ref[...] + partial          # broadcast-accumulate


def online_contrastive_loss(embeddings, labels, margin=1.0, *, tile=128):
    """All-pairs OnlineContrastiveLoss forward.  embeddings: (B, D), labels: (B,)."""
    B, D = embeddings.shape
    if B < 2:
        # torch.cat([], ...).mean() of an empty pair set is NaN.
        return jnp.array(jnp.nan, dtype=jnp.float32)

    tm = tn = tile
    b_pad = pl.cdiv(B, tile) * tile
    gi = b_pad // tm
    gj = b_pad // tn

    # Pad batch dim to a lane/sublane-friendly multiple; padded entries are
    # excluded in-kernel via the (col < B) validity test, so padded labels
    # colliding with real labels cannot create spurious pairs.
    emb_p = jnp.pad(embeddings, ((0, b_pad - B), (0, 0)))
    lab_p = jnp.pad(labels.astype(jnp.int32), (0, b_pad - B))
    lab_rows = lab_p.reshape(b_pad, 1)    # row-side labels -> (tm, 1) blocks
    lab_cols = lab_p.reshape(1, b_pad)    # col-side labels -> (1, tn) blocks

    # Precompute squared norms once (O(B*D)); padded rows are zero.
    sq = jnp.sum(emb_p.astype(jnp.float32) ** 2, axis=1, keepdims=True)
    n_rows = sq                           # (b_pad, 1) -> (tm, 1) blocks
    n_cols = sq.reshape(1, b_pad)         # (1, b_pad) -> (1, tn) blocks

    kernel = functools.partial(_online_contrastive_kernel, float(margin), B)

    # Column-side blocks for lower-triangular (skipped) steps are clamped to
    # block max(i, j): consecutive identical block indices => no re-DMA.
    col_emb_map = lambda i, j: (jnp.maximum(i, j), 0)
    col_vec_map = lambda i, j: (0, jnp.maximum(i, j))

    out = pl.pallas_call(
        kernel,
        out_shape=jax.ShapeDtypeStruct((gi * 8, 128), jnp.float32),
        grid_spec=pltpu.PrefetchScalarGridSpec(
            num_scalar_prefetch=0,
            grid=(gi, gj),
            in_specs=[
                pl.BlockSpec((tm, D), lambda i, j: (i, 0)),   # row embeddings
                pl.BlockSpec((tn, D), col_emb_map),           # col embeddings
                pl.BlockSpec((tm, 1), lambda i, j: (i, 0)),   # row sq-norms
                pl.BlockSpec((1, tn), col_vec_map),           # col sq-norms
                pl.BlockSpec((tm, 1), lambda i, j: (i, 0)),   # row labels
                pl.BlockSpec((1, tn), col_vec_map),           # col labels
            ],
            out_specs=pl.BlockSpec((8, 128), lambda i, j: (i, 0)),
        ),
        compiler_params=pltpu.CompilerParams(
            dimension_semantics=("parallel", "arbitrary")),
    )(emb_p, emb_p, n_rows, n_cols, lab_rows, lab_cols)

    # Every element of a row-block's (8,128) output holds the same accumulated
    # partial sum; pick one per row-block and finish the mean with the static
    # all-pairs count B*(B-1)/2.
    partials = out.reshape(gi, 8, 128)[:, 0, 0]
    n_pairs = B * (B - 1) // 2
    return jnp.sum(partials) / float(n_pairs)


def _reference(embeddings, labels, margin):
    """Pure-JAX transcription of the PyTorch forward (gather-by-pair-index)."""
    B = embeddings.shape[0]
    idx_i, idx_j = jnp.triu_indices(B, k=1)
    same = labels[idx_i] == labels[idx_j]
    diff = embeddings[idx_i] - embeddings[idx_j]
    d2 = jnp.sum(diff * diff, axis=1)
    positive_loss = d2
    negative_loss = jnp.maximum(margin - jnp.sqrt(d2), 0.0) ** 2
    per_pair = jnp.where(same, positive_loss, negative_loss)
    return jnp.mean(per_pair)   # == mean(cat([positive_loss, negative_loss]))


if __name__ == "__main__":
    B, D = 8, 32
    margin = 1.0

    key = jax.random.PRNGKey(0)
    k_emb, k_lab = jax.random.split(key)
    embeddings = jax.random.normal(k_emb, (B, D), dtype=jnp.float32)
    labels = jax.random.randint(k_lab, (B,), 0, 3, dtype=jnp.int32)

    loss = online_contrastive_loss(embeddings, labels, margin)
    loss = jax.block_until_ready(loss)

    ref = _reference(embeddings, labels, margin)
    assert jnp.allclose(loss, ref, atol=1e-3, rtol=1e-3), (loss, ref)

    print("KERNEL_OK")
</pallas_src>

<mosaic_0001>
module attributes {stable_mosaic.version = 11 : i64} {
  func.func @_online_contrastive_kernel(%arg0: i32, %arg1: i32, %arg2: memref<128x32xf32, #tpu.memory_space<vmem>>, %arg3: memref<128x32xf32, #tpu.memory_space<vmem>>, %arg4: memref<128x1xf32, #tpu.memory_space<vmem>>, %arg5: memref<1x128xf32, #tpu.memory_space<vmem>>, %arg6: memref<128x1xi32, #tpu.memory_space<vmem>>, %arg7: memref<1x128xi32, #tpu.memory_space<vmem>>, %arg8: memref<8x128xf32, #tpu.memory_space<vmem>>) attributes {dimension_semantics = [#tpu.dimension_semantics<parallel>, #tpu.dimension_semantics<arbitrary>], iteration_bounds = array<i64: 1, 1>, scalar_prefetch = 0 : i64, scratch_operands = 0 : i64, tpu.core_type = #tpu.core_type<tc>, window_params = [{transform_indices = @transform_0, window_bounds = array<i64: 128, 32>}, {transform_indices = @transform_1, window_bounds = array<i64: 128, 32>}, {transform_indices = @transform_2, window_bounds = array<i64: 128, 1>}, {transform_indices = @transform_3, window_bounds = array<i64: 1, 128>}, {transform_indices = @transform_4, window_bounds = array<i64: 128, 1>}, {transform_indices = @transform_5, window_bounds = array<i64: 1, 128>}, {transform_indices = @transform_6, window_bounds = array<i64: 8, 128>}]} {
    %c0_i32 = arith.constant 0 : i32
    %0 = arith.cmpi eq, %arg1, %c0_i32 : i32
    %1 = arith.extui %0 : i1 to i32
    %c0_i32_0 = arith.constant 0 : i32
    %2 = arith.cmpi ne, %1, %c0_i32_0 : i32
    scf.if %2 {
      %cst = arith.constant 0.000000e+00 : f32
      %6 = vector.broadcast %cst : f32 to vector<8x128xf32>
      %c0 = arith.constant 0 : index
      %c0_2 = arith.constant 0 : index
      %7 = vector.load %arg8[%c0, %c0_2] : memref<8x128xf32, #tpu.memory_space<vmem>>, vector<8x128xf32>
      tpu.vector_store %arg8[%c0, %c0_2], %6 {strides = array<i32>} : memref<8x128xf32, #tpu.memory_space<vmem>>, vector<8x128xf32>,
    } else {
    }
    %3 = arith.cmpi sge, %arg1, %arg0 : i32
    %4 = arith.extui %3 : i1 to i32
    %c0_i32_1 = arith.constant 0 : i32
    %5 = arith.cmpi ne, %4, %c0_i32_1 : i32
    scf.if %5 {
      %c0 = arith.constant 0 : index
      %c0_2 = arith.constant 0 : index
      %6 = vector.load %arg2[%c0, %c0_2] : memref<128x32xf32, #tpu.memory_space<vmem>>, vector<128x32xf32>
      %c0_3 = arith.constant 0 : index
      %c0_4 = arith.constant 0 : index
      %7 = vector.load %arg3[%c0_3, %c0_4] : memref<128x32xf32, #tpu.memory_space<vmem>>, vector<128x32xf32>
      %cst = arith.constant dense<0.000000e+00> : vector<128x128xf32>
      %8 = tpu.matmul %6, %7, %cst {dimension_numbers = #tpu.dot_dimension_numbers<[1], [1], [0], [0], [0, 0, 1, 0], [], []>} : vector<128x32xf32>, vector<128x32xf32>, vector<128x128xf32> -> vector<128x128xf32>
      %c0_5 = arith.constant 0 : index
      %c0_6 = arith.constant 0 : index
      %9 = vector.load %arg4[%c0_5, %c0_6] : memref<128x1xf32, #tpu.memory_space<vmem>>, vector<128x1xf32>
      %c0_7 = arith.constant 0 : index
      %c0_8 = arith.constant 0 : index
      %10 = vector.load %arg5[%c0_7, %c0_8] : memref<1x128xf32, #tpu.memory_space<vmem>>, vector<1x128xf32>
      %11 = vector.broadcast %9 : vector<128x1xf32> to vector<128x128xf32>
      %12 = vector.broadcast %10 : vector<1x128xf32> to vector<128x128xf32>
      %13 = arith.addf %11, %12 : vector<128x128xf32>
      %cst_9 = arith.constant 2.000000e+00 : f32
      %14 = vector.broadcast %cst_9 : f32 to vector<128x128xf32>
      %15 = arith.mulf %14, %8 : vector<128x128xf32>
      %16 = arith.subf %13, %15 : vector<128x128xf32>
      %cst_10 = arith.constant 0.000000e+00 : f32
      %17 = vector.broadcast %cst_10 : f32 to vector<128x128xf32>
      %18 = arith.maximumf %16, %17 : vector<128x128xf32>
      %c128_i32 = arith.constant 128 : i32
      %19 = arith.muli %arg0, %c128_i32 : i32
      %20 = tpu.iota {dimensions = array<i32: 0>} : vector<128x128xi32>
      %21 = vector.broadcast %19 : i32 to vector<128x128xi32>
      %22 = arith.addi %21, %20 : vector<128x128xi32>
      %c128_i32_11 = arith.constant 128 : i32
      %23 = arith.muli %arg1, %c128_i32_11 : i32
      %24 = tpu.iota {dimensions = array<i32: 1>} : vector<128x128xi32>
      %25 = vector.broadcast %23 : i32 to vector<128x128xi32>
      %26 = arith.addi %25, %24 : vector<128x128xi32>
      %27 = arith.cmpi sgt, %26, %22 : vector<128x128xi32>
      %c8_i32 = arith.constant 8 : i32
      %28 = vector.broadcast %c8_i32 : i32 to vector<128x128xi32>
      %29 = arith.cmpi slt, %26, %28 : vector<128x128xi32>
      %30 = arith.andi %27, %29 : vector<128x128xi1>
      %c0_12 = arith.constant 0 : index
      %c0_13 = arith.constant 0 : index
      %31 = vector.load %arg6[%c0_12, %c0_13] : memref<128x1xi32, #tpu.memory_space<vmem>>, vector<128x1xi32>
      %c0_14 = arith.constant 0 : index
      %c0_15 = arith.constant 0 : index
      %32 = vector.load %arg7[%c0_14, %c0_15] : memref<1x128xi32, #tpu.memory_space<vmem>>, vector<1x128xi32>
      %33 = vector.broadcast %31 : vector<128x1xi32> to vector<128x128xi32>
      %34 = vector.broadcast %32 : vector<1x128xi32> to vector<128x128xi32>
      %35 = arith.cmpi eq, %33, %34 : vector<128x128xi32>
      %36 = arith.andi %30, %35 : vector<128x128xi1>
      %cst_16 = arith.constant dense<true> : vector<128x128xi1>
      %37 = arith.xori %35, %cst_16 : vector<128x128xi1>
      %38 = arith.andi %30, %37 : vector<128x128xi1>
      %39 = math.sqrt %18 : vector<128x128xf32>
      %cst_17 = arith.constant 1.000000e+00 : f32
      %40 = vector.broadcast %cst_17 : f32 to vector<128x128xf32>
      %41 = arith.subf %40, %39 : vector<128x128xf32>
      %cst_18 = arith.constant 0.000000e+00 : f32
      %42 = vector.broadcast %cst_18 : f32 to vector<128x128xf32>
      %43 = arith.maximumf %41, %42 : vector<128x128xf32>
      %cst_19 = arith.constant 0.000000e+00 : f32
      %44 = vector.broadcast %cst_19 : f32 to vector<128x128xf32>
      %45 = arith.select %36, %18, %44 : vector<128x128xi1>, vector<128x128xf32>
      %46 = arith.mulf %43, %43 : vector<128x128xf32>
      %cst_20 = arith.constant 0.000000e+00 : f32
      %47 = vector.broadcast %cst_20 : f32 to vector<128x128xf32>
      %48 = arith.select %38, %46, %47 : vector<128x128xi1>, vector<128x128xf32>
      %49 = arith.addf %45, %48 : vector<128x128xf32>
      %50 = vector.shape_cast %49 : vector<128x128xf32> to vector<1x128x128xf32>
      %cst_21 = arith.constant dense<0.000000e+00> : vector<1xf32>
      %51 = vector.multi_reduction <add>, %50, %cst_21 [1, 2] : vector<1x128x128xf32> to vector<1xf32>
      %52 = vector.shape_cast %51 : vector<1xf32> to vector<1x1x1xf32>
      %53 = vector.extract %52[0, 0, 0] : f32 from vector<1x1x1xf32>
      %c0_22 = arith.constant 0 : index
      %c0_23 = arith.constant 0 : index
      %54 = vector.load %arg8[%c0_22, %c0_23] : memref<8x128xf32, #tpu.memory_space<vmem>>, vector<8x128xf32>
      %55 = vector.broadcast %53 : f32 to vector<8x128xf32>
      %56 = arith.addf %54, %55 : vector<8x128xf32>
      %c0_24 = arith.constant 0 : index
      %c0_25 = arith.constant 0 : index
      %57 = vector.load %arg8[%c0_24, %c0_25] : memref<8x128xf32, #tpu.memory_space<vmem>>, vector<8x128xf32>
      tpu.vector_store %arg8[%c0_24, %c0_25], %56 {strides = array<i32>} : memref<8x128xf32, #tpu.memory_space<vmem>>, vector<8x128xf32>,
    } else {
    }
    return
  }
  func.func @transform_0(%arg0: i32, %arg1: i32) -> (i32, i32) {
    %c0_i32 = arith.constant 0 : i32
    %c0_i32_0 = arith.constant 0 : i32
    return %arg0, %c0_i32 : i32, i32
  }
  func.func @transform_1(%arg0: i32, %arg1: i32) -> (i32, i32) {
    %0 = arith.maxsi %arg0, %arg1 : i32
    %c0_i32 = arith.constant 0 : i32
    %c0_i32_0 = arith.constant 0 : i32
    return %0, %c0_i32 : i32, i32
  }
  func.func @transform_2(%arg0: i32, %arg1: i32) -> (i32, i32) {
    %c0_i32 = arith.constant 0 : i32
    %c0_i32_0 = arith.constant 0 : i32
    return %arg0, %c0_i32 : i32, i32
  }
  func.func @transform_3(%arg0: i32, %arg1: i32) -> (i32, i32) {
    %0 = arith.maxsi %arg0, %arg1 : i32
    %c0_i32 = arith.constant 0 : i32
    %c0_i32_0 = arith.constant 0 : i32
    return %c0_i32, %0 : i32, i32
  }
  func.func @transform_4(%arg0: i32, %arg1: i32) -> (i32, i32) {
    %c0_i32 = arith.constant 0 : i32
    %c0_i32_0 = arith.constant 0 : i32
    return %arg0, %c0_i32 : i32, i32
  }
  func.func @transform_5(%arg0: i32, %arg1: i32) -> (i32, i32) {
    %0 = arith.maxsi %arg0, %arg1 : i32
    %c0_i32 = arith.constant 0 : i32
    %c0_i32_0 = arith.constant 0 : i32
    return %c0_i32, %0 : i32, i32
  }
  func.func @transform_6(%arg0: i32, %arg1: i32) -> (i32, i32) {
    %c0_i32 = arith.constant 0 : i32
    %c0_i32_0 = arith.constant 0 : i32
    return %arg0, %c0_i32 : i32, i32
  }
}

</mosaic_0001>

<bundles_post_ra>
// kernel: tpu_custom_call.1
= control target key start
LH: loop header
LB: loop body
LE: loop exit
PB: predicated region body
PF: predicated region fallthrough
CT: control target
= control target key end

     0   :  { %vm65_vm0 = vcmask 261120   ;;  %v1180_v6 = vmov 0   ;;  %s2490_s0 = inlined_call_operand.vmem [shape: f32[128,32], index: 0, kind: input, shape index: {}]   ;;  %s2491_s1 = inlined_call_operand.vmem [shape: f32[128,32], index: 1, kind: input, shape index: {}]   ;;  %s2492_s2 = inlined_call_operand.vmem [shape: f32[128,1], index: 2, kind: input, shape index: {}]   ;;  %s2493_s3 = inlined_call_operand.vmem [shape: f32[1,128], index: 3, kind: input, shape index: {}]   ;;  %s2494_s4 = inlined_call_operand.vmem [shape: s32[128,1], index: 4, kind: input, shape index: {}]   ;;  %s2495_s5 = inlined_call_operand.vmem [shape: s32[1,128], index: 5, kind: input, shape index: {}]   ;;  %s2496_s6 = inlined_call_operand.hbm [shape: f32[8,128], index: 6, kind: output, shape index: {}]  }
   0x1   :  { %v49_v0 = vld [vmem:[%s2491_s1] sm:$0xff]  ;;  %v50_v1 = vld [vmem:[%s2491_s1 + $0x8] sm:$0xff]  ;;  %v51_v2 = vld [vmem:[%s2491_s1 + $0x10] sm:$0xff]  ;;  %1122 = vset.pattern.permute.xlu0 %v1180_v6  ;;  %1123 = vset.pattern.permute.xlu1 %v1180_v6 }
   0x2   :  { %v1052_v3 = vpack.c.bf16 %v50_v1, %v49_v0  ;;  %vm1229_vm1 = vmpackc.low %vm65_vm0, %vm65_vm0  ;;  %v52_v5 = vld [vmem:[%s2491_s1 + $0x18] sm:$0xff]  ;;  %v33_v8 = vld [vmem:[%s2490_s0] sm:$0xff] }
   0x3   :  { %v1058_v7 = vpack.c.bf16 %v52_v5, %v51_v2  ;;  %v53_v9 = vld [vmem:[%s2491_s1 + $0x20] sm:$0xff]  ;;  %v54_v10 = vld [vmem:[%s2491_s1 + $0x28] sm:$0xff]  ;;  %1028 = vmatprep.mubr.msk.f32.mxu0 %vm65_vm0, %v33_v8  ;;  %v309_v14 = vld [vmem:[%s2492_s2 + $0x10] sm:$0xff] }
   0x4   :  { %1054 = vmatprep.subr.msk.bf16.mxu0 %vm1229_vm1, %v1052_v3  ;;  %1100 = vmatprep.subr.msk.bf16.mxu1 %vm1229_vm1, %v1052_v3  ;;  %v41_v11 = vld [vmem:[%s2490_s0 + $0x40] sm:$0xff]  ;;  %v1064_v12 = vpack.c.bf16 %v54_v10, %v53_v9  ;;  %v55_v15 = vld [vmem:[%s2491_s1 + $0x30] sm:$0xff]  ;;  %v56_v16 = vld [vmem:[%s2491_s1 + $0x38] sm:$0xff] }
   0x5   :  { %1057 = vmatpush3.bf16.xpose.msk.msra.mxu0 %vm1229_vm1, %v1052_v3  ;;  %1108 = vmatpush3.bf16.xpose.msk.msra.mxu1 %vm1229_vm1, %v1052_v3  ;;  %v307_v13 = vld [vmem:[%s2492_s2] sm:$0xff]  ;;  %v308_v17 = vld [vmem:[%s2492_s2 + $0x8] sm:$0xff]  ;;  %v310_v18 = vld [vmem:[%s2492_s2 + $0x18] sm:$0xff]  ;;  %v1070_v19 = vpack.c.bf16 %v56_v16, %v55_v15 }
   0x6   :  { %1060 = vmatprep.subr.msk.bf16.mxu0 %vm1229_vm1, %v1058_v7  ;;  %1101 = vmatprep.subr.msk.bf16.mxu1 %vm1229_vm1, %v1058_v7  ;;  %v311_v20 = vld [vmem:[%s2492_s2 + $0x20] sm:$0xff]  ;;  %v312_v21 = vld [vmem:[%s2492_s2 + $0x28] sm:$0xff] }
   0x7   :  { %1040 = vmatprep.mubr.msk.f32.mxu1 %vm65_vm0, %v41_v11  ;;  %326 = vperm.xlu0 %1122, %v307_v13   ;;  %v57_v22 = vld [vmem:[%s2491_s1 + $0x40] sm:$0xff]  ;;  %v58_v23 = vld [vmem:[%s2491_s1 + $0x48] sm:$0xff] }
   0x8   :  { %336 = vperm.xlu1 %1123, %v309_v14  }
   0xb   :  { %331 = vperm.xlu0 %1122, %v308_v17  }
   0xc   :  { %341 = vperm.xlu1 %1123, %v310_v18  }
   0xd   :  { %1063 = vmatpush3.bf16.xpose.msk.msra.mxu0 %vm1229_vm1, %v1058_v7  ;;  %1109 = vmatpush3.bf16.xpose.msk.msra.mxu1 %vm1229_vm1, %v1058_v7 }
   0xe   :  { %1066 = vmatprep.subr.msk.bf16.mxu0 %vm1229_vm1, %v1064_v12  ;;  %1102 = vmatprep.subr.msk.bf16.mxu1 %vm1229_vm1, %v1064_v12 }
   0xf   :  { %346 = vperm.xlu0 %1122, %v311_v20  }
  0x10   :  { %351 = vperm.xlu1 %1123, %v312_v21  }
  0x15   :  { %1069 = vmatpush3.bf16.xpose.msk.msra.mxu0 %vm1229_vm1, %v1064_v12  ;;  %1110 = vmatpush3.bf16.xpose.msk.msra.mxu1 %vm1229_vm1, %v1064_v12 }
  0x16   :  { %1072 = vmatprep.subr.msk.bf16.mxu0 %vm1229_vm1, %v1070_v19  ;;  %1103 = vmatprep.subr.msk.bf16.mxu1 %vm1229_vm1, %v1070_v19 }
  0x17   :  { %11 = vsyncpa [#allocation3], 0  ;;  %v313_v24 = vld [vmem:[%s2492_s2 + $0x30] sm:$0xff]  ;;  %v314_v25 = vld [vmem:[%s2492_s2 + $0x38] sm:$0xff]  ;;  %v1076_v26 = vpack.c.bf16 %v58_v23, %v57_v22 }
  0x18   :  { %356 = vperm.xlu0 %1122, %v313_v24   ;;  %361 = vperm.xlu1 %1123, %v314_v25   ;;  %v315_v27 = vld [vmem:[%s2492_s2 + $0x40] sm:$0xff]  ;;  %v316_v28 = vld [vmem:[%s2492_s2 + $0x48] sm:$0xff]  ;;  %v59_v29 = vld [vmem:[%s2491_s1 + $0x50] sm:$0xff] }
  0x19   :  { %v60_v30 = vld [vmem:[%s2491_s1 + $0x58] sm:$0xff]  ;;  %v317_v31 = vld [vmem:[%s2492_s2 + $0x50] sm:$0xff]  ;;  %v319_v34 = vld [vmem:[%s2492_s2 + $0x60] sm:$0xff] }
  0x1a   :  { %v318_v32 = vld [vmem:[%s2492_s2 + $0x58] sm:$0xff]  ;;  %v1082_v33 = vpack.c.bf16 %v60_v30, %v59_v29  ;;  %v320_v35 = vld [vmem:[%s2492_s2 + $0x68] sm:$0xff]  ;;  %v61_v36 = vld [vmem:[%s2491_s1 + $0x60] sm:$0xff] }
  0x1b   :  { %v62_v37 = vld [vmem:[%s2491_s1 + $0x68] sm:$0xff]  ;;  %v547_v38 = vld [vmem:[%s2494_s4] sm:$0xff]  ;;  %v321_v41 = vld [vmem:[%s2492_s2 + $0x70] sm:$0xff] }
  0x1c   :  { %366 = vperm.xlu0 %1122, %v315_v27   ;;  %371 = vperm.xlu1 %1123, %v316_v28   ;;  %v548_v39 = vld [vmem:[%s2494_s4 + $0x8] sm:$0xff]  ;;  %v1088_v40 = vpack.c.bf16 %v62_v37, %v61_v36  ;;  %v549_v42 = vld [vmem:[%s2494_s4 + $0x10] sm:$0xff]  ;;  %v64_v44 = vld [vmem:[%s2491_s1 + $0x78] sm:$0xff] }
  0x1d   :  { %1075 = vmatpush3.bf16.xpose.msk.msra.mxu0 %vm1229_vm1, %v1070_v19  ;;  %1111 = vmatpush3.bf16.xpose.msk.msra.mxu1 %vm1229_vm1, %v1070_v19  ;;  %v63_v43 = vld [vmem:[%s2491_s1 + $0x70] sm:$0xff]  ;;  %v322_v45 = vld [vmem:[%s2492_s2 + $0x78] sm:$0xff]  ;;  %v551_v48 = vld [vmem:[%s2494_s4 + $0x20] sm:$0xff] }
  0x1e   :  { %1078 = vmatprep.subr.msk.bf16.mxu0 %vm1229_vm1, %v1076_v26  ;;  %1104 = vmatprep.subr.msk.bf16.mxu1 %vm1229_vm1, %v1076_v26  ;;  %v550_v46 = vld [vmem:[%s2494_s4 + $0x18] sm:$0xff]  ;;  %v1094_v47 = vpack.c.bf16 %v64_v44, %v63_v43  ;;  %v552_v49 = vld [vmem:[%s2494_s4 + $0x28] sm:$0xff]  ;;  %v553_v50 = vld [vmem:[%s2494_s4 + $0x30] sm:$0xff] }
  0x1f   :  { %v554_v51 = vld [vmem:[%s2494_s4 + $0x38] sm:$0xff]  ;;  %v555_v52 = vld [vmem:[%s2494_s4 + $0x40] sm:$0xff]  ;;  %v556_v53 = vld [vmem:[%s2494_s4 + $0x48] sm:$0xff] }
  0x20   :  { %376 = vperm.xlu0 %1122, %v317_v31   ;;  %381 = vperm.xlu1 %1123, %v318_v32   ;;  %v557_v54 = vld [vmem:[%s2494_s4 + $0x50] sm:$0xff]  ;;  %v558_v55 = vld [vmem:[%s2494_s4 + $0x58] sm:$0xff]  ;;  %v34_v56 = vld [vmem:[%s2490_s0 + $0x8] sm:$0xff] }
  0x21   :  { %v42_v57 = vld [vmem:[%s2490_s0 + $0x48] sm:$0xff]  ;;  %v35_v58 = vld [vmem:[%s2490_s0 + $0x10] sm:$0xff]  ;;  %v559_v60 = vld [vmem:[%s2494_s4 + $0x60] sm:$0xff] }
  0x22   :  { %v43_v59 = vld [vmem:[%s2490_s0 + $0x50] sm:$0xff]  ;;  %v560_v61 = vld [vmem:[%s2494_s4 + $0x68] sm:$0xff]  ;;  %v36_v62 = vld [vmem:[%s2490_s0 + $0x18] sm:$0xff] }
  0x23   :  { %v44_v63 = vld [vmem:[%s2490_s0 + $0x58] sm:$0xff]  ;;  %v37_v0 = vld [vmem:[%s2490_s0 + $0x20] sm:$0xff]  ;;  %v561_v2 = vld [vmem:[%s2494_s4 + $0x70] sm:$0xff] }
  0x24   :  { %386 = vperm.xlu0 %1122, %v319_v34   ;;  %391 = vperm.xlu1 %1123, %v320_v35   ;;  %v45_v1 = vld [vmem:[%s2490_s0 + $0x60] sm:$0xff]  ;;  %v562_v3 = vld [vmem:[%s2494_s4 + $0x78] sm:$0xff]  ;;  %v38_v4 = vld [vmem:[%s2490_s0 + $0x28] sm:$0xff] }
  0x25   :  { %1081 = vmatpush3.bf16.xpose.msk.msra.mxu0 %vm1229_vm1, %v1076_v26  ;;  %1112 = vmatpush3.bf16.xpose.msk.msra.mxu1 %vm1229_vm1, %v1076_v26  ;;  %v46_v5 = vld [vmem:[%s2490_s0 + $0x68] sm:$0xff]  ;;  %v39_v6 = vld [vmem:[%s2490_s0 + $0x30] sm:$0xff]  ;;  %v40_v8 = vld [vmem:[%s2490_s0 + $0x38] sm:$0xff] }
  0x26   :  { %1084 = vmatprep.subr.msk.bf16.mxu0 %vm1229_vm1, %v1082_v33  ;;  %1105 = vmatprep.subr.msk.bf16.mxu1 %vm1229_vm1, %v1082_v33  ;;  %v47_v7 = vld [vmem:[%s2490_s0 + $0x70] sm:$0xff]  ;;  %v48_v9 = vld [vmem:[%s2490_s0 + $0x78] sm:$0xff]  ;;  %v1509_v20 = vld [vmem:[%s2493_s3] ss:$0 sm:$0xff] }
  0x28   :  { %565 = vperm.xlu0 %1122, %v547_v38   ;;  %568 = vperm.xlu1 %1123, %v548_v39  }
  0x2c   :  { %396 = vperm.xlu0 %1122, %v321_v41   ;;  %571 = vperm.xlu1 %1123, %v549_v42  }
  0x2d   :  { %1087 = vmatpush3.bf16.xpose.msk.msra.mxu0 %vm1229_vm1, %v1082_v33  ;;  %1113 = vmatpush3.bf16.xpose.msk.msra.mxu1 %vm1229_vm1, %v1082_v33 }
  0x2e   :  { %1090 = vmatprep.subr.msk.bf16.mxu0 %vm1229_vm1, %v1088_v40  ;;  %1106 = vmatprep.subr.msk.bf16.mxu1 %vm1229_vm1, %v1088_v40 }
  0x30   :  { %401 = vperm.xlu0 %1122, %v322_v45   ;;  %574 = vperm.xlu1 %1123, %v550_v46  }
  0x34   :  { %577 = vperm.xlu0 %1122, %v551_v48   ;;  %580 = vperm.xlu1 %1123, %v552_v49  }
  0x35   :  { %1093 = vmatpush3.bf16.xpose.msk.msra.mxu0 %vm1229_vm1, %v1088_v40  ;;  %1114 = vmatpush3.bf16.xpose.msk.msra.mxu1 %vm1229_vm1, %v1088_v40  ;;  %v475_v40 = vlaneseq }
  0x36   :  { %1096 = vmatprep.subr.msk.bf16.mxu0 %vm1229_vm1, %v1094_v47  ;;  %1107 = vmatprep.subr.msk.bf16.mxu1 %vm1229_vm1, %v1094_v47 }
  0x38   :  { %583 = vperm.xlu0 %1122, %v553_v50   ;;  %586 = vperm.xlu1 %1123, %v554_v51   ;;  %v1535_v51 = vshrl.u32 %v475_v40, 7 }
  0x3c   :  { %589 = vperm.xlu0 %1122, %v555_v52   ;;  %592 = vperm.xlu1 %1123, %v556_v53  }
  0x3d   :  { %1099 = vmatpush3.bf16.xpose.msk.msra.mxu0 %vm1229_vm1, %v1094_v47  ;;  %1115 = vmatpush3.bf16.xpose.msk.msra.mxu1 %vm1229_vm1, %v1094_v47 }
  0x40   :  { %595 = vperm.xlu0 %1122, %v557_v54   ;;  %598 = vperm.xlu1 %1123, %v558_v55   ;;  %v1542_v54 = vadd.s32 8, %v1535_v51 }
  0x44   :  { %1029 = vmatmul.mubr.msk.f32.vlgmr.msra.gmra.mrb[0].mxu0 %vm65_vm0, %v34_v56  ;;  %1041 = vmatmul.mubr.msk.f32.vlgmr.msra.gmra.mrb[0].mxu1 %vm65_vm0, %v42_v57 }
  0x45   :  { %1031 = vmatprep.mubr.msk.f32.mxu0 %vm65_vm0, %v35_v58  ;;  %1043 = vmatprep.mubr.msk.f32.mxu1 %vm65_vm0, %v43_v59  ;;  %v1548_v59 = vand.u32 127, %v475_v40 }
  0x46   :  { %601 = vperm.xlu0 %1122, %v559_v60   ;;  %604 = vperm.xlu1 %1123, %v560_v61   ;;  %v1551_v60 = vadd.s32 16, %v1535_v51  ;;  %v1554_v61 = vadd.s32 24, %v1535_v51 }
  0x47   :  { %vm515_vm2 = vcmp.gt.s32.totalorder %v1548_v59, %v1542_v54  ;;  %vm2498_vm3 = vcmp.lt.s32.totalorder %v1548_v59, 8  ;;  %vm514_vm4 = vcmp.gt.s32.totalorder %v1548_v59, %v1535_v51 }
  0x48   :  { %1032 = vmatmul.mubr.msk.f32.gmra.mrb[2].mxu0 %vm65_vm0, %v36_v62  ;;  %1044 = vmatmul.mubr.msk.f32.gmra.mrb[2].mxu1 %vm65_vm0, %v44_v63  ;;  %v1557_v62 = vadd.s32 32, %v1535_v51  ;;  %v1560_v63 = vadd.s32 40, %v1535_v51  ;;  %vm516_vm5 = vcmp.gt.s32.totalorder %v1548_v59, %v1551_v60  ;;  %vm517_vm8 = vcmp.gt.s32.totalorder %v1548_v59, %v1554_v61  ;;  %vm1672_vm12 = vmand %vm515_vm2, %vm2498_vm3 }
  0x49   :  { %1034 = vmatprep.mubr.msk.f32.mxu0 %vm65_vm0, %v37_v0  ;;  %1046 = vmatprep.mubr.msk.f32.mxu1 %vm65_vm0, %v45_v1  ;;  %v1563_v0 = vadd.s32 48, %v1535_v51  ;;  %v1566_v1 = vadd.s32 56, %v1535_v51 }
  0x4a   :  { %607 = vperm.xlu0 %1122, %v561_v2   ;;  %610 = vperm.xlu1 %1123, %v562_v3   ;;  %v1569_v2 = vadd.s32 64, %v1535_v51  ;;  %v1572_v3 = vadd.s32 72, %v1535_v51 }
  0x4c   :  { %1035 = vmatmul.mubr.msk.f32.gmra.mrb[4].mxu0 %vm65_vm0, %v38_v4  ;;  %1047 = vmatmul.mubr.msk.f32.gmra.mrb[4].mxu1 %vm65_vm0, %v46_v5 }
  0x4d   :  { %1037 = vmatprep.mubr.msk.f32.mxu0 %vm65_vm0, %v39_v6  ;;  %1049 = vmatprep.mubr.msk.f32.mxu1 %vm65_vm0, %v47_v7  ;;  %v1579_v6 = vadd.s32 80, %v1535_v51  ;;  %v1582_v7 = vadd.s32 88, %v1535_v51 }
  0x50   :  { %1038 = vmatmul.mubr.msk.f32.gmra.mrb[6].mxu0 %vm65_vm0, %v40_v8  ;;  %1050 = vmatmul.mubr.msk.f32.gmra.mrb[6].mxu1 %vm65_vm0, %v48_v9  ;;  %vm1707_vm0 = vmand %vm514_vm4, %vm2498_vm3 }
  0x51   :  { %vm1729_vm4 = vmand %vm516_vm5, %vm2498_vm3 }
  0x52   :  { %vm1756_vm5 = vmand %vm517_vm8, %vm2498_vm3 }
  0x86   :  { %v327_v10 = vpop.permute.xlu0 %326 }
  0x87   :  { %v337_v11 = vpop.permute.xlu1 %336  ;;  %v410_v27 = vadd.f32 %v1509_v20, %v327_v10  ;;  %v1589_v10 = vadd.s32 96, %v1535_v51 }
  0x88   :  { %v412_v41 = vadd.f32 %v1509_v20, %v337_v11  ;;  %v1592_v11 = vadd.s32 104, %v1535_v51 }
  0x8a   :  { %v332_v12 = vpop.permute.xlu0 %331 }
  0x8b   :  { %v342_v13 = vpop.permute.xlu1 %341  ;;  %v411_v23 = vadd.f32 %v1509_v20, %v332_v12 }
  0x8c   :  { %v413_v48 = vadd.f32 %v1509_v20, %v342_v13 }
  0x8e   :  { %v1496_v14 = vpop.permute.xlu0 %346 }
  0x8f   :  { %v1498_v15 = vpop.permute.xlu1 %351 }
  0x97   :  { %v1500_v16 = vpop.permute.xlu0 %356  ;;  %v1502_v17 = vpop.permute.xlu1 %361 }
  0x9b   :  { %v367_v18 = vpop.permute.xlu0 %366  ;;  %v1504_v19 = vpop.permute.xlu1 %371 }
  0x9c   :  { %v418_v9 = vadd.f32 %v1509_v20, %v367_v18  ;;  %v1603_v18 = vadd.s32 120, %v1535_v51 }
  0x9f   :  { %v1515_v29 = vpop.permute.xlu0 %376  ;;  %v1517_v30 = vpop.permute.xlu1 %381 }
  0xa3   :  { %v387_v49 = vpop.permute.xlu0 %386  ;;  %v392_v50 = vpop.permute.xlu1 %391 }
  0xa4   :  { %v1635_v40 = vadd.f32 %v1509_v20, %v392_v50 }
  0xa7   :  { %v1574_v5 = vpop.permute.xlu0 %565 }
 0x117   :  { %v1030_v21 = vpop.f32.mrb[0].mxu0  ;;  %v1511_v22 = vpop.f32.mrb[0].mxu1 }
 0x118   :  { %v427_v24 = vmul.f32 2.0, %v1030_v21  ;;  %v228_v25 = vpop.f32.mrb[1].mxu0  ;;  %v268_v26 = vpop.f32.mrb[1].mxu1  ;;  %v414_v21 = vadd.f32 %v1509_v20, %v1496_v14  ;;  %v1611_v14 = vadd.f32 %v1509_v20, %v1502_v17  ;;  %v421_v17 = vadd.f32 %v1509_v20, %v1517_v30 }
 0x119   :  { %v426_v28 = vmul.f32 2.0, %v228_v25  ;;  %v434_v4 = vmul.f32 2.0, %v268_v26 }
 0x11a   :  { %v443_v31 = vsub.f32 %v411_v23, %v427_v24  ;;  %v1597_v23 = vpop.permute.xlu1 %568  ;;  %v1600_v24 = vadd.s32 112, %v1535_v51 }
 0x11b   :  { %v442_v32 = vsub.f32 %v410_v27, %v426_v28  ;;  %v1033_v33 = vpop.f32.mrb[2].mxu0  ;;  %v1519_v34 = vpop.f32.mrb[2].mxu1  ;;  %v415_v27 = vadd.f32 %v1509_v20, %v1498_v15  ;;  %v416_v28 = vadd.f32 %v1509_v20, %v1500_v16  ;;  %v1624_v15 = vld [vmem:[%s2495_s5] ss:$0 sm:$0xff]  ;;  %v435_v16 = vmul.f32 2.0, %v1511_v22  ;;  %s1182_s5 = smov [#allocation2]  }
 0x11c   :  { %v1521_v35 = vmax.f32 %v443_v31, 0.0  ;;  %v238_v36 = vpop.f32.mrb[3].mxu0  ;;  %v1523_v37 = vpop.f32.mrb[3].mxu1  ;;  %v429_v44 = vmul.f32 2.0, %v1033_v33  ;;  %v450_v31 = vsub.f32 %v418_v9, %v434_v4  ;;  %v1617_v33 = vadd.f32 %v1509_v20, %v1515_v29  ;;  %s922_s26 = sshll.u32 %s1182_s5, 4  ;;  %s923_s26 = int_to_ptr.vmem [resolvable:$true] %s922_s26 }
 0x11d   :  { %v1525_v38 = vmax.f32 %v442_v32, 0.0  ;;  %v428_v39 = vmul.f32 2.0, %v238_v36  ;;  %v419_v32 = vadd.f32 %v1509_v20, %v1504_v19  ;;  %vm616_vm6 = vcmp.eq.s32.totalorder %v1574_v5, %v1624_v15  ;;  %s1156_s28 = scalar_lea.vmem %s923_s26, 128  ;;  %p1161_p1 = scmp.lt.s32.totalorder %s923_s26, %s923_s26 }
 0x11e   :  { %1124 = vrsqrt.f32 %v1521_v35  ;;  %v445_v55 = vsub.f32 %v413_v48, %v429_v44  ;;  %vm617_vm7 = vcmp.eq.s32.totalorder %v1597_v23, %v1624_v15  ;;  %v1647_v44 = vmax.f32 %v450_v31, 0.0  ;;  %p1157_p0 = scmp.ne.s32.totalorder %s923_s26, %s1156_s28  ;;  %p1162_p2 = scmp.lt.s32.totalorder %s1156_s28, %s1156_s28 }
 0x11f   :  { %v1036_v42 = vpop.f32.mrb[4].mxu0  ;;  %v1528_v43 = vpop.f32.mrb[4].mxu1  ;;  %1126 = vrsqrt.f32 %v1525_v38  ;;  %v444_v47 = vsub.f32 %v412_v41, %v428_v39  ;;  %v1632_v39 = vadd.f32 %v1509_v20, %v387_v49  ;;  %vm689_vm9 = vcmp.eq.f32.partialorder %v1521_v35, inf  ;;  %vm1691_vm15 = vmand %vm1672_vm12, %vm617_vm7 }
 0x120   :  { %v248_v45 = vpop.f32.mrb[5].mxu0  ;;  %v1531_v46 = vpop.f32.mrb[5].mxu1  ;;  %v1584_v8 = vmax.f32 %v445_v55, 0.0  ;;  %v431_v25 = vmul.f32 2.0, %v1036_v42  ;;  %v437_v48 = vmul.f32 2.0, %v1519_v34  ;;  %vm682_vm10 = vcmp.eq.f32.partialorder %v1525_v38, inf  ;;  %p1163_p3 = por %p1162_p2, %p1161_p1 }
 0x121   :  { %v1544_v56 = vmax.f32 %v444_v47, 0.0  ;;  %v430_v12 = vmul.f32 2.0, %v248_v45  ;;  %v397_v41 = vpop.permute.xlu0 %396  ;;  %v1649_v45 = vpop.permute.xlu1 %571  ;;  %v451_v47 = vsub.f32 %v419_v32, %v435_v16  ;;  %v692_v9 = vand.u32 2147483648, %v1521_v35 }
 0x122   :  { %v447_v42 = vsub.f32 %v415_v27, %v431_v25  ;;  %v1645_v30 = vadd.f32 %v1509_v20, %v397_v41  ;;  %vm2499_vm11 = vcmp.eq.s32.totalorder %v1649_v45, %v1624_v15  ;;  %vm691_vm13 = vcmp.eq.f32.partialorder %v1521_v35, 0.0  ;;  %p1164_p4 = pnand %p1163_p3, %p1157_p0 }
 0x123   :  { %v1537_v52 = vpop.f32.mrb[6].mxu0  ;;  %v1539_v53 = vpop.f32.mrb[6].mxu1  ;;  %1128 = vrsqrt.f32 %v1544_v56  ;;  %v446_v36 = vsub.f32 %v414_v21, %v430_v12  ;;  %vm684_vm14 = vcmp.eq.f32.partialorder %v1525_v38, 0.0  ;;  %v685_v21 = vand.u32 2147483648, %v1525_v38  ;;  %vm1772_vm8 = vmand %vm1729_vm4, %vm2499_vm11 }
 0x124   :  { %v258_v57 = vpop.f32.mrb[7].mxu0  ;;  %v1546_v58 = vpop.f32.mrb[7].mxu1  ;;  %1130 = vrsqrt.f32 %v1584_v8  ;;  %v433_v49 = vmul.f32 2.0, %v1537_v52  ;;  %v1665_v34 = vmax.f32 %v447_v42, 0.0  ;;  %v453_v25 = vsub.f32 %v421_v17, %v437_v48 }
 0x125   :  { %v432_v29 = vmul.f32 2.0, %v258_v57  ;;  %v1658_v55 = vmax.f32 %v446_v36, 0.0  ;;  %1132 = vrsqrt.f32 %v1647_v44  ;;  %v1695_v17 = vpop.permute.xlu1 %574  ;;  %v439_v36 = vmul.f32 2.0, %v1528_v43 }
 0x126   :  { %v449_v27 = vsub.f32 %v1611_v14, %v433_v49  ;;  %v1697_v14 = vmax.f32 %v451_v47, 0.0  ;;  %vm2497_vm1 = vcmp.eq.s32.totalorder %v1695_v17, %v1624_v15  ;;  %v825_v43 = vsel %vm1691_vm15, %v1521_v35, 0.0 }
 0x127   :  { %v448_v57 = vsub.f32 %v416_v28, %v432_v29  ;;  %1134 = vrsqrt.f32 %v1658_v55  ;;  %v1719_v42 = vmax.f32 %v453_v25, 0.0  ;;  %vm696_vm2 = vcmp.eq.f32.partialorder %v1544_v56, inf }
 0x128   :  { %v1125_v13 = vpop.eup %1124  ;;  %1136 = vrsqrt.f32 %v1665_v34  ;;  %v1722_v51 = vmax.f32 %v449_v27, 0.0  ;;  %v699_v60 = vand.u32 2147483648, %v1544_v56  ;;  %v440_v27 = vmul.f32 2.0, %v1546_v58 }
 0x129   :  { %v1127_v26 = vpop.eup %1126  ;;  %v688_v19 = vmul.f32 %v1125_v13, %v1521_v35  ;;  %v436_v13 = vmul.f32 2.0, %v1523_v37  ;;  %v1684_v31 = vmax.f32 %v448_v57, 0.0  ;;  %2526 = vst [vmem:[#allocation5_spill] sm:$0xff] %v1719_v42  ;;  %vm717_vm3 = vcmp.eq.f32.partialorder %v1665_v34, inf }
 0x12a   :  { %v681_v22 = vmul.f32 %v1127_v26, %v1525_v38  ;;  %v438_v26 = vmul.f32 2.0, %v1531_v46  ;;  %v402_v46 = vpop.permute.xlu0 %401  ;;  %v720_v5 = vand.u32 2147483648, %v1665_v34  ;;  %vm710_vm11 = vcmp.eq.f32.partialorder %v1658_v55, inf }
 0x12b   :  { %v690_v50 = vsel %vm689_vm9, %v1521_v35, %v688_v19  ;;  %v452_v19 = vsub.f32 %v1617_v33, %v436_v13  ;;  %v1712_v41 = vadd.f32 %v1509_v20, %v402_v46  ;;  %1138 = vrsqrt.f32 %v1684_v31  ;;  %vm1742_vm9 = vmand %vm1707_vm0, %vm616_vm6 }
 0x12c   :  { %v683_v12 = vsel %vm682_vm10, %v1525_v38, %v681_v22  ;;  %v693_v37 = vsel %vm691_vm13, %v692_v9, %v690_v50  ;;  %v454_v49 = vsub.f32 %v1632_v39, %v438_v26  ;;  %1140 = vrsqrt.f32 %v1697_v14 }
 0x12d   :  { %v1129_v4 = vpop.eup %1128  ;;  %v686_v28 = vsel %vm684_vm14, %v685_v21, %v683_v12  ;;  %v793_v33 = vsub.f32 1.0, %v693_v37  ;;  %v1748_v57 = vmax.f32 %v452_v19, 0.0  ;;  %v824_v12 = vsel %vm1742_vm9, %v1525_v38, 0.0  ;;  %vm1786_vm14 = vmand %vm1756_vm5, %vm2497_vm1 }
 0x12e   :  { %v695_v54 = vmul.f32 %v1129_v4, %v1544_v56  ;;  %v1131_v32 = vpop.eup %1130  ;;  %v792_v22 = vsub.f32 1.0, %v686_v28  ;;  %v455_v4 = vsub.f32 %v1635_v40, %v439_v36  ;;  %vm703_vm10 = vcmp.eq.f32.partialorder %v1584_v8, inf }
 0x12f   :  { %v702_v47 = vmul.f32 %v1131_v32, %v1584_v8  ;;  %v809_v9 = vmax.f32 %v793_v33, 0.0  ;;  %vm698_vm13 = vcmp.eq.f32.partialorder %v1544_v56, 0.0  ;;  %1142 = vrsqrt.f32 %v1722_v51  ;;  %v1133_v61 = vpop.eup %1132 }
 0x130   :  { %v697_v48 = vsel %vm696_vm2, %v1544_v56, %v695_v54  ;;  %v808_v13 = vmax.f32 %v792_v22, 0.0  ;;  %v441_v21 = vmul.f32 2.0, %v1539_v53  ;;  %1144 = vrsqrt.f32 %v1719_v42 }
 0x131   :  { %v700_v40 = vsel %vm698_vm13, %v699_v60, %v697_v48  ;;  %v704_v25 = vsel %vm703_vm10, %v1584_v8, %v702_v47  ;;  %v1778_v26 = vmax.f32 %v454_v49, 0.0  ;;  %v2536_v53 = vmov 0  ;;  %v1135_v58 = vpop.eup %1134  ;;  %v1819_v47 = vpop.permute.xlu0 %577 }
 0x132   :  { %v2537_v53 = vsel %vm1786_vm14, 4294967295, %v2536_v53  ;;  %vm705_vm10 = vcmp.eq.f32.partialorder %v1584_v8, 0.0  ;;  %v706_v28 = vand.u32 2147483648, %v1584_v8  ;;  %1146 = vrsqrt.f32 %v1748_v57  ;;  %v1137_v22 = vpop.eup %1136 }
 0x133   :  { %2535 = vst [vmem:[#allocation6_spill] sm:$0xff] %v1778_v26  ;;  %v1795_v54 = vmax.f32 %v455_v4, 0.0  ;;  %vm2502_vm13 = vmmov 1   ;;  %v841_v46 = vmul.f32 %v809_v9, %v809_v9  ;;  %v794_v36 = vsub.f32 1.0, %v700_v40 }
 0x134   :  { %vm1801_vm1 = vmxor %vm617_vm7, %vm2502_vm13  ;;  %v826_v33 = vsel %vm1772_vm8, %v1544_v56, 0.0  ;;  %v840_v48 = vmul.f32 %v808_v13, %v808_v13  ;;  %v707_v49 = vsel %vm705_vm10, %v706_v28, %v704_v25  ;;  %v457_v60 = vsub.f32 %v1712_v41, %v441_v21  ;;  %v1850_v25 = vpop.permute.xlu1 %580 }
 0x135   :  { %vm1815_vm2 = vmxor %vm616_vm6, %vm2502_vm13  ;;  %1148 = vrsqrt.f32 %v1778_v26  ;;  %v456_v4 = vsub.f32 %v1645_v30, %v440_v27  ;;  %v737_v9 = vmul.f32 %v1133_v61, %v1647_v44  ;;  %v709_v41 = vmul.f32 %v1135_v58, %v1658_v55  ;;  %v1139_v13 = vpop.eup %1138 }
 0x136   :  { %vm665_vm10 = vmand %vm1672_vm12, %vm1801_vm1  ;;  %1150 = vrsqrt.f32 %v1795_v54  ;;  %v795_v52 = vsub.f32 1.0, %v707_v49  ;;  %v810_v40 = vmax.f32 %v794_v36, 0.0  ;;  %v716_v21 = vmul.f32 %v1137_v22, %v1665_v34  ;;  %v1141_v61 = vpop.eup %1140  ;;  %v1865_v36 = vpop.permute.xlu0 %583 }
 0x137   :  { %vm664_vm7 = vmand %vm1707_vm0, %vm1815_vm2  ;;  %v857_v30 = vsel %vm665_vm10, %v841_v46, 0.0  ;;  %vm712_vm1 = vcmp.eq.f32.partialorder %v1658_v55, 0.0  ;;  %v713_v29 = vand.u32 2147483648, %v1658_v55  ;;  %v1854_v28 = vmax.f32 %v457_v60, 0.0 }
 0x138   :  { %v856_v27 = vsel %vm664_vm7, %v840_v48, 0.0  ;;  %v734_v58 = vand.u32 2147483648, %v1722_v51  ;;  %v1860_v32 = vmax.f32 %v456_v4, 0.0  ;;  %vm738_vm10 = vcmp.eq.f32.partialorder %v1647_v44, inf }
 0x139   :  { %v1143_v46 = vpop.eup %1142  ;;  %v1871_v22 = vadd.f32 %v857_v30, %v825_v43  ;;  %v711_v23 = vsel %vm710_vm11, %v1658_v55, %v709_v41  ;;  %v723_v48 = vmul.f32 %v1139_v13, %v1684_v31  ;;  %vm724_vm0 = vcmp.eq.f32.partialorder %v1684_v31, inf }
 0x13a   :  { %v1145_v49 = vpop.eup %1144  ;;  %vm2542_vm7 = vcmp.eq.s32.totalorder %v1649_v45, %v1624_v15  ;;  %v1892_v35 = vadd.f32 %v856_v27, %v824_v12  ;;  %v1894_v16 = vmax.f32 %v795_v52, 0.0  ;;  %v842_v43 = vmul.f32 %v810_v40, %v810_v40 }
 0x13b   :  { %vm1882_vm12 = vmxor %vm2542_vm7, %vm2502_vm13  ;;  %v718_v45 = vsel %vm717_vm3, %v1665_v34, %v716_v21  ;;  %vm726_vm7 = vcmp.eq.f32.partialorder %v1684_v31, 0.0  ;;  %v727_v41 = vand.u32 2147483648, %v1684_v31  ;;  %vm733_vm15 = vcmp.eq.f32.partialorder %v1722_v51, 0.0 }
 0x13c   :  { %v1147_v4 = vpop.eup %1146  ;;  %v744_v38 = vmul.f32 %v1141_v61, %v1697_v14  ;;  %vm2545_vm9 = vcmp.lt.s32.totalorder %v1548_v59, 8  ;;  %vm2546_vm6 = vcmp.gt.s32.totalorder %v1548_v59, %v1557_v62  ;;  %v730_v12 = vmul.f32 %v1143_v46, %v1722_v51  ;;  %vm666_vm3 = vmand %vm1729_vm4, %vm1882_vm12  ;;  %v1925_v62 = vpop.permute.xlu1 %586 }
 0x13d   :  { %vm1910_vm2 = vmand %vm2546_vm6, %vm2545_vm9  ;;  %1152 = vrsqrt.f32 %v1860_v32  ;;  %v714_v13 = vsel %vm712_vm1, %v713_v29, %v711_v23  ;;  %v739_v30 = vsel %vm738_vm10, %v1647_v44, %v737_v9  ;;  %v725_v52 = vsel %vm724_vm0, %v1684_v31, %v723_v48 }
 0x13e   :  { %vm2549_vm1 = vcmp.eq.f32.partialorder %v1665_v34, 0.0  ;;  %vm740_vm10 = vcmp.eq.f32.partialorder %v1647_v44, 0.0  ;;  %v741_v9 = vand.u32 2147483648, %v1647_v44  ;;  %vm2550_vm4 = vmmov %vm2545_vm9  ;;  %vm2551_vm12 = vcmp.gt.s32.totalorder %v1548_v59, %v1560_v63  ;;  %v1961_v63 = vpop.permute.xlu0 %589 }
 0x13f   :  { %v1934_v40 = vsel %vm2549_vm1, %v720_v5, %v718_v45  ;;  %v1149_v21 = vpop.eup %1148  ;;  %vm1943_vm9 = vmand %vm2551_vm12, %vm2550_vm4  ;;  %v858_v61 = vsel %vm666_vm3, %v842_v43, 0.0  ;;  %vm745_vm0 = vcmp.eq.f32.partialorder %v1697_v14, inf  ;;  %v751_v5 = vmul.f32 %v1147_v4, %v1748_v57 }
 0x140   :  { %v758_v27 = vmul.f32 %v1145_v49, %v1719_v42  ;;  %v1151_v29 = vpop.eup %1150  ;;  %vm2554_vm1 = vmmov %vm2550_vm4  ;;  %vm2555_vm6 = vcmp.gt.s32.totalorder %v1548_v59, %v1563_v0  ;;  %v1963_v23 = vsel %vm740_vm10, %v741_v9, %v739_v30  ;;  %v746_v48 = vsel %vm745_vm0, %v1697_v14, %v744_v38 }
 0x141   :  { %vm1955_vm11 = vmand %vm2555_vm6, %vm2554_vm1  ;;  %v796_v49 = vsub.f32 1.0, %v714_v13  ;;  %vm2558_vm12 = vcmp.eq.s32.totalorder %v1695_v17, %v1624_v15  ;;  %v728_v60 = vsel %vm726_vm7, %v727_v41, %v725_v52  ;;  %vm2561_vm0 = vcmp.eq.f32.partialorder %v1722_v51, inf  ;;  %v2029_v13 = vpop.permute.xlu1 %592 }
 0x142   :  { %vm1971_vm6 = vmxor %vm2558_vm12, %vm2502_vm13  ;;  %v732_v43 = vsel %vm2561_vm0, %v1722_v51, %v730_v12  ;;  %v748_v45 = vand.u32 2147483648, %v1697_v14  ;;  %1154 = vrsqrt.f32 %v1854_v28  ;;  %vm2563_vm4 = vcmp.gt.s32.totalorder %v1548_v59, %v1566_v1 }
 0x143   :  { %vm2562_vm12 = vmmov %vm2554_vm1  ;;  %v2564_v17 = vmov 0  ;;  %v1999_v4 = vadd.f32 %v858_v61, %v826_v33  ;;  %vm752_vm7 = vcmp.eq.f32.partialorder %v1748_v57, inf  ;;  %vm759_vm0 = vcmp.eq.f32.partialorder %v1719_v42, inf }
 0x144   :  { %vm1991_vm1 = vmand %vm2563_vm4, %vm2562_vm12  ;;  %v765_v41 = vmul.f32 %v1149_v21, %v1778_v26  ;;  %vm2566_vm10 = vcmp.eq.s32.totalorder %v1819_v47, %v1624_v15  ;;  %v2567_v1 = vmov 0  ;;  %v753_v37 = vsel %vm752_vm7, %v1748_v57, %v751_v5 }
 0x145   :  { %v2565_v17 = vsel %vm1991_vm1, 4294967295, %v2564_v17  ;;  %vm2008_vm4 = vmxor %vm2566_vm10, %vm2502_vm13  ;;  %v755_v56 = vand.u32 2147483648, %v1748_v57  ;;  %v760_v33 = vsel %vm759_vm0, %v1719_v42, %v758_v27  ;;  %v762_v38 = vand.u32 2147483648, %v1719_v42 }
 0x146   :  { %v2568_v1 = vsel %vm2008_vm4, 4294967295, %v2567_v1  ;;  %vm2569_vm10 = vcmp.gt.s32.totalorder %v1548_v59, %v1569_v2  ;;  %v2570_v12 = vmov 0  ;;  %v735_v30 = vsel %vm733_vm15, %v734_v58, %v732_v43 }
 0x147   :  { %vm2025_vm3 = vmand %vm2569_vm10, %vm2562_vm12  ;;  %v797_v52 = vsub.f32 1.0, %v1934_v40  ;;  %v798_v9 = vsub.f32 1.0, %v728_v60  ;;  %v812_v21 = vmax.f32 %v796_v49, 0.0  ;;  %vm2572_vm0 = vcmp.eq.s32.totalorder %v1819_v47, %v1624_v15  ;;  %v2074_v40 = vpop.permute.xlu0 %595  ;;  %v1153_v60 = vpop.eup %1152 }
 0x148   :  { %v2571_v12 = vsel %vm2025_vm3, 4294967295, %v2570_v12  ;;  %vm2043_vm12 = vmand %vm1910_vm2, %vm2572_vm0  ;;  %v2573_v2 = vmov 0  ;;  %vm2575_vm10 = vcmp.eq.s32.totalorder %v1850_v25, %v1624_v15  ;;  %v2576_v61 = vmov 0 }
 0x149   :  { %v2574_v2 = vsel %vm2043_vm12, 4294967295, %v2573_v2  ;;  %vm2051_vm7 = vmxor %vm2575_vm10, %vm2502_vm13  ;;  %vm754_vm8 = vcmp.eq.f32.partialorder %v1748_v57, 0.0  ;;  %vm761_vm14 = vcmp.eq.f32.partialorder %v1719_v42, 0.0  ;;  %vm766_vm0 = vcmp.eq.f32.partialorder %v1778_v26, inf }
 0x14a   :  { %v2577_v61 = vsel %vm2051_vm7, 4294967295, %v2576_v61  ;;  %v772_v47 = vmul.f32 %v1151_v29, %v1795_v54  ;;  %vm2578_vm10 = vcmp.lt.s32.totalorder %v1548_v59, 8  ;;  %vm2579_vm13 = vcmp.gt.s32.totalorder %v1548_v59, %v1572_v3 }
 0x14b   :  { %vm2070_vm12 = vmand %vm2579_vm13, %vm2578_vm10  ;;  %v2580_v58 = vmov 0  ;;  %vm2582_vm15 = vcmp.eq.f32.partialorder %v1697_v14, 0.0  ;;  %v2080_v27 = vsel %vm754_vm8, %v755_v56, %v753_v37  ;;  %v2082_v29 = vsel %vm761_vm14, %v762_v38, %v760_v33 }
 0x14c   :  { %v2581_v58 = vsel %vm2070_vm12, 4294967295, %v2580_v58  ;;  %v2078_v5 = vsel %vm2582_vm15, %v748_v45, %v746_v48  ;;  %v767_v49 = vsel %vm766_vm0, %v1778_v26, %v765_v41  ;;  %vm2583_vm3 = vmmov 1  }
 0x14d   :  { %vm2584_vm13 = vcmp.eq.s32.totalorder %v1865_v36, %v1624_v15  ;;  %vm768_vm14 = vcmp.eq.f32.partialorder %v1778_v26, 0.0  ;;  %v769_v48 = vand.u32 2147483648, %v1778_v26  ;;  %vm773_vm15 = vcmp.eq.f32.partialorder %v1795_v54, inf }
 0x14e   :  { %vm2089_vm10 = vmxor %vm2584_vm13, %vm2583_vm3  ;;  %v799_v43 = vsub.f32 1.0, %v735_v30  ;;  %v813_v45 = vmax.f32 %v797_v52, 0.0  ;;  %v814_v41 = vmax.f32 %v798_v9, 0.0  ;;  %v843_v37 = vmul.f32 %v1894_v16, %v1894_v16  ;;  %v2142_v52 = vpop.permute.xlu1 %598 }
 0x14f   :  { %v844_v56 = vmul.f32 %v812_v21, %v812_v21  ;;  %vm2587_vm13 = vcmp.eq.s32.totalorder %v1850_v25, %v1624_v15  ;;  %v2588_v33 = vmov 0  ;;  %vm2590_vm12 = vcmp.eq.s32.totalorder %v1865_v36, %v1624_v15  ;;  %v1155_v21 = vpop.eup %1154 }
 0x150   :  { %vm2111_vm8 = vmand %vm1943_vm9, %vm2587_vm13  ;;  %v2591_v38 = vmov 0  ;;  %vm2593_vm7 = vcmp.lt.s32.totalorder %v1548_v59, 8  ;;  %vm2594_vm1 = vcmp.gt.s32.totalorder %v1548_v59, %v1579_v6  ;;  %v2595_v25 = vmov 0 }
 0x151   :  { %v2589_v33 = vsel %vm2111_vm8, 4294967295, %v2588_v33  ;;  %vm2120_vm0 = vmand %vm1955_vm11, %vm2590_vm12  ;;  %v2133_v16 = vsel %vm768_vm14, %v769_v48, %v767_v49  ;;  %v774_v30 = vsel %vm773_vm15, %v1795_v54, %v772_v47  ;;  %v776_v36 = vand.u32 2147483648, %v1795_v54 }
 0x152   :  { %v2592_v38 = vsel %vm2120_vm0, 4294967295, %v2591_v38  ;;  %vm2129_vm4 = vmand %vm2594_vm1, %vm2593_vm7  ;;  %v779_v6 = vmul.f32 %v1153_v60, %v1860_v32  ;;  %v800_v9 = vsub.f32 1.0, %v1963_v23  ;;  %vm2597_vm14 = vcmp.eq.s32.totalorder %v1925_v62, %v1624_v15 }
 0x153   :  { %v2596_v25 = vsel %vm2129_vm4, 4294967295, %v2595_v25  ;;  %vm2152_vm15 = vmxor %vm2597_vm14, %vm2583_vm3  ;;  %v783_v49 = vand.u32 2147483648, %v1860_v32  ;;  %v801_v23 = vsub.f32 1.0, %v2078_v5  ;;  %v815_v60 = vmax.f32 %v799_v43, 0.0 }
 0x154   :  { %vm2600_vm14 = vcmp.eq.s32.totalorder %v1961_v63, %v1624_v15  ;;  %v2601_v48 = vmov 0  ;;  %vm2603_vm12 = vmmov %vm2593_vm7  ;;  %vm2604_vm13 = vcmp.gt.s32.totalorder %v1548_v59, %v1582_v7  ;;  %v2605_v19 = vmov 0 }
 0x155   :  { %vm2167_vm1 = vmxor %vm2600_vm14, %vm2583_vm3  ;;  %v845_v26 = vmul.f32 %v813_v45, %v813_v45  ;;  %v846_v5 = vmul.f32 %v814_v41, %v814_v41  ;;  %vm2608_vm14 = vnez %v2568_v1  ;;  %v790_v50 = vand.u32 2147483648, %v1854_v28 }
 0x156   :  { %v2602_v48 = vsel %vm2167_vm1, 4294967295, %v2601_v48  ;;  %vm2176_vm4 = vmand %vm2604_vm13, %vm2603_vm12  ;;  %vm2610_vm13 = vcmp.eq.s32.totalorder %v1925_v62, %v1624_v15  ;;  %vm2611_vm12 = vnez %v2565_v17  ;;  %v802_v0 = vsub.f32 1.0, %v2080_v27 }
 0x157   :  { %v2606_v19 = vsel %vm2176_vm4, 4294967295, %v2605_v19  ;;  %vm2607_vm7 = vmand %vm1756_vm5, %vm1971_vm6  ;;  %vm2614_vm5 = vcmp.eq.f32.partialorder %v1795_v54, 0.0  ;;  %v888_v1 = vadd.f32 %v1871_v22, %v1892_v35  ;;  %vm2615_vm6 = vcmp.eq.f32.partialorder %v1860_v32, inf }
 0x158   :  { %v859_v43 = vsel %vm2607_vm7, %v843_v37, 0.0  ;;  %vm2609_vm0 = vmand %vm1910_vm2, %vm2608_vm14  ;;  %v777_v39 = vsel %vm2614_vm5, %v776_v36, %v774_v30  ;;  %v781_v62 = vsel %vm2615_vm6, %v1860_v32, %v779_v6  ;;  %v786_v45 = vmul.f32 %v1155_v21, %v1854_v28 }
 0x159   :  { %v860_v42 = vsel %vm2609_vm0, %v844_v56, 0.0  ;;  %vm2195_vm4 = vmand %vm2611_vm12, %vm2610_vm13  ;;  %v816_v41 = vmax.f32 %v800_v9, 0.0  ;;  %vm2616_vm0 = vnez %v2574_v2  ;;  %vm2617_vm7 = vcmp.eq.s32.totalorder %v1961_v63, %v1624_v15 }
 0x15a   :  { %v828_v37 = vsel %vm2616_vm0, %v1658_v55, 0.0  ;;  %vm2618_vm14 = vnez %v2571_v12  ;;  %v2619_v22 = vmov 0  ;;  %vm2621_vm6 = vcmp.lt.s32.totalorder %v1548_v59, 8 }
 0x15b   :  { %vm2223_vm13 = vmand %vm2618_vm14, %vm2617_vm7  ;;  %vm2622_vm8 = vcmp.gt.s32.totalorder %v1548_v59, %v1589_v10  ;;  %v2623_v55 = vmov 0  ;;  %v803_v35 = vsub.f32 1.0, %v2082_v29  ;;  %vm2625_vm7 = vnez %v2537_v53 }
 0x15c   :  { %v2620_v22 = vsel %vm2223_vm13, 4294967295, %v2619_v22  ;;  %vm2236_vm0 = vmand %vm2622_vm8, %vm2621_vm6  ;;  %v2626_v63 = vsel %vm2625_vm7, %v1584_v8, 0.0  ;;  %v876_v27 = vadd.f32 %v860_v42, %v828_v37  ;;  %v889_v56 = vadd.f32 %v888_v1, %v1999_v4 }
 0x15d   :  { %v2624_v55 = vsel %vm2236_vm0, 4294967295, %v2623_v55  ;;  %v875_v2 = vadd.f32 %v859_v43, %v2626_v63  ;;  %vm2627_vm5 = vcmp.eq.s32.totalorder %v2029_v13, %v1624_v15  ;;  %v817_v30 = vmax.f32 %v801_v23, 0.0  ;;  %vm2632_vm7 = vmand %vm1955_vm11, %vm2089_vm10  ;;  %v602_v13 = vpop.permute.xlu0 %601 }
 0x15e   :  { %vm2250_vm2 = vmxor %vm2627_vm5, %vm2583_vm3  ;;  %v847_v36 = vmul.f32 %v815_v60, %v815_v60  ;;  %vm2630_vm8 = vnez %v2577_v61  ;;  %v862_v42 = vsel %vm2632_vm7, %v846_v5, 0.0  ;;  %vm2633_vm0 = vnez %v2581_v58 }
 0x15f   :  { %vm2631_vm6 = vmand %vm1943_vm9, %vm2630_vm8  ;;  %vm2636_vm1 = vcmp.eq.f32.partialorder %v1860_v32, 0.0  ;;  %v818_v4 = vmax.f32 %v802_v0, 0.0  ;;  %v890_v46 = vadd.f32 %v889_v56, %v875_v2  ;;  %vm2637_vm11 = vcmp.eq.s32.totalorder %v2074_v40, %v1624_v15 }
 0x160   :  { %v861_v8 = vsel %vm2631_vm6, %v845_v26, 0.0  ;;  %vm2269_vm13 = vmand %vm2633_vm0, %vm2627_vm5  ;;  %v784_v20 = vsel %vm2636_vm1, %v783_v49, %v781_v62  ;;  %v804_v26 = vsub.f32 1.0, %v2133_v16  ;;  %vm2640_vm10 = vcmp.lt.s32.totalorder %v1548_v59, 8 }
 0x161   :  { %vm2280_vm9 = vmxor %vm2637_vm11, %vm2583_vm3  ;;  %vm2641_vm8 = vcmp.gt.s32.totalorder %v1548_v59, %v1592_v11  ;;  %v2642_v29 = vmov 0  ;;  %vm2644_vm1 = vcmp.eq.f32.partialorder %v1854_v28, inf  ;;  %vm2645_vm7 = vnez %v2589_v33  ;;  %v608_v12 = vpop.permute.xlu0 %607 }
 0x162   :  { %vm2289_vm6 = vmand %vm2641_vm8, %vm2640_vm10  ;;  %v788_v3 = vsel %vm2644_vm1, %v1854_v28, %v786_v45  ;;  %v829_v16 = vsel %vm2645_vm7, %v1665_v34, 0.0  ;;  %vm2646_vm5 = vnez %v2592_v38  ;;  %v848_v9 = vmul.f32 %v816_v41, %v816_v41 }
 0x163   :  { %v2643_v29 = vsel %vm2289_vm6, 4294967295, %v2642_v29  ;;  %v830_v6 = vsel %vm2646_vm5, %v1684_v31, 0.0  ;;  %v805_v11 = vsub.f32 1.0, %v777_v39  ;;  %v877_v21 = vadd.f32 %v861_v8, %v829_v16  ;;  %vm2647_vm10 = vmmov %vm2637_vm11  ;;  %v605_v31 = vpop.permute.xlu1 %604 }
 0x164   :  { %v878_v49 = vadd.f32 %v862_v42, %v830_v6  ;;  %v891_v23 = vadd.f32 %v890_v46, %v876_v27  ;;  %vm2648_vm8 = vnez %v2596_v25  ;;  %v2649_v34 = vmov 0  ;;  %vm2651_vm5 = vmand %vm2611_vm12, %vm2152_vm15 }
 0x165   :  { %vm2311_vm1 = vmand %vm2648_vm8, %vm2647_vm10  ;;  %vm789_vm7 = vcmp.eq.f32.partialorder %v1854_v28, 0.0  ;;  %v819_v33 = vmax.f32 %v803_v35, 0.0  ;;  %v849_v38 = vmul.f32 %v817_v30, %v817_v30  ;;  %v863_v60 = vsel %vm2651_vm5, %v847_v36, 0.0 }
 0x166   :  { %v2650_v34 = vsel %vm2311_vm1, 4294967295, %v2649_v34  ;;  %vm2515_vm10 = vcmp.eq.s32.totalorder %v602_v13, %v1624_v15  ;;  %v791_v40 = vsel %vm789_vm7, %v790_v50, %v788_v3  ;;  %v806_v5 = vsub.f32 1.0, %v784_v20  ;;  %v2687_v3 = vld [vmem:[#allocation6_spill] sm:$0xff] }
 0x167   :  { %v892_v43 = vadd.f32 %v891_v23, %v877_v21  ;;  %vm2652_vm6 = vcmp.eq.s32.totalorder %v2142_v52, %v1624_v15  ;;  %vm2655_vm15 = vcmp.lt.s32.totalorder %v1548_v59, 8  ;;  %vm2656_vm12 = vcmp.gt.s32.totalorder %v1548_v59, %v1600_v24  ;;  %v611_v58 = vpop.permute.xlu1 %610 }
 0x168   :  { %vm2330_vm1 = vmxor %vm2652_vm6, %vm2583_vm3  ;;  %v2657_v47 = vmov 0  ;;  %v820_v39 = vmax.f32 %v804_v26, 0.0  ;;  %v831_v50 = vsel %vm2195_vm4, %v1722_v51, 0.0  ;;  %v850_v0 = vmul.f32 %v818_v4, %v818_v4 }
 0x169   :  { %vm2339_vm5 = vmand %vm2656_vm12, %vm2655_vm15  ;;  %vm2659_vm6 = vnez %v2602_v48  ;;  %vm2661_vm11 = vcmp.eq.s32.totalorder %v2142_v52, %v1624_v15  ;;  %vm2662_vm15 = vnez %v2606_v19  ;;  %v821_v62 = vmax.f32 %v805_v11, 0.0  ;;  %v2686_v19 = vld [vmem:[#allocation5_spill] sm:$0xff] }
 0x16a   :  { %v2658_v47 = vsel %vm2339_vm5, 4294967295, %v2657_v47  ;;  %vm2660_vm7 = vmand %vm2618_vm14, %vm2659_vm6  ;;  %v879_v45 = vadd.f32 %v863_v60, %v831_v50  ;;  %v893_v7 = vadd.f32 %v892_v43, %v878_v49  ;;  %vm2667_vm14 = vcmp.lt.s32.totalorder %v1548_v59, 8 }
 0x16b   :  { %v864_v1 = vsel %vm2660_vm7, %v848_v9, 0.0  ;;  %vm2356_vm12 = vmand %vm2662_vm15, %vm2661_vm11  ;;  %vm2668_vm6 = vcmp.gt.s32.totalorder %v1548_v59, %v1603_v18  ;;  %v2669_v52 = vmov 0  ;;  %v807_v48 = vsub.f32 1.0, %v791_v40 }
 0x16c   :  { %vm2363_vm4 = vmxor %vm2515_vm10, %vm2583_vm3  ;;  %vm2671_vm7 = vnez %v2620_v22  ;;  %v851_v37 = vmul.f32 %v819_v33, %v819_v33  ;;  %v894_v18 = vadd.f32 %v893_v7, %v879_v45  ;;  %v822_v22 = vmax.f32 %v806_v5, 0.0 }
 0x16d   :  { %vm2372_vm11 = vmand %vm2668_vm6, %vm2667_vm14  ;;  %v832_v41 = vsel %vm2671_vm7, %v1647_v44, 0.0  ;;  %vm629_vm6 = vcmp.eq.s32.totalorder %v605_v31, %v1624_v15  ;;  %vm2674_vm7 = vnez %v2624_v55  ;;  %v833_v63 = vsel %vm2269_vm13, %v1697_v14, 0.0 }
 0x16e   :  { %v2670_v52 = vsel %vm2372_vm11, 4294967295, %v2669_v52  ;;  %vm2672_vm10 = vmand %vm2633_vm0, %vm2250_vm2  ;;  %v880_v59 = vadd.f32 %v864_v1, %v832_v41  ;;  %vm2673_vm11 = vcmp.eq.s32.totalorder %v602_v13, %v1624_v15  ;;  %v852_v2 = vmul.f32 %v820_v39, %v820_v39 }
 0x16f   :  { %v865_v35 = vsel %vm2672_vm10, %v849_v38, 0.0  ;;  %vm675_vm14 = vmand %vm2662_vm15, %vm2330_vm1  ;;  %vm630_vm10 = vcmp.eq.s32.totalorder %v608_v12, %v1624_v15  ;;  %v823_v25 = vmax.f32 %v807_v48, 0.0  ;;  %v853_v36 = vmul.f32 %v821_v62, %v821_v62 }
 0x170   :  { %vm2393_vm5 = vmand %vm2674_vm7, %vm2673_vm11  ;;  %v881_v56 = vadd.f32 %v865_v35, %v833_v63  ;;  %v895_v10 = vadd.f32 %v894_v18, %v880_v59  ;;  %v867_v8 = vsel %vm675_vm14, %v851_v37, 0.0  ;;  %v835_v26 = vsel %vm2356_vm12, %v2686_v19, 0.0 }
 0x171   :  { %vm2677_vm2 = vmand %vm2648_vm8, %vm2280_vm9  ;;  %vm2680_vm9 = vnez %v2650_v34  ;;  %vm2681_vm8 = vnez %v2643_v29  ;;  %v854_v4 = vmul.f32 %v822_v22, %v822_v22  ;;  %v883_v61 = vadd.f32 %v867_v8, %v835_v26 }
 0x172   :  { %v866_v27 = vsel %vm2677_vm2, %v850_v0, 0.0  ;;  %vm676_vm0 = vmand %vm2674_vm7, %vm2363_vm4  ;;  %v834_v30 = vsel %vm2680_vm9, %v1748_v57, 0.0  ;;  %vm631_vm2 = vcmp.eq.s32.totalorder %v611_v58, %v1624_v15  ;;  %v896_v20 = vadd.f32 %v895_v10, %v881_v56 }
 0x173   :  { %vm2413_vm13 = vmxor %vm629_vm6, %vm2583_vm3  ;;  %v882_v53 = vadd.f32 %v866_v27, %v834_v30  ;;  %v868_v46 = vsel %vm676_vm0, %v852_v2, 0.0  ;;  %v836_v16 = vsel %vm2393_vm5, %v2687_v3, 0.0  ;;  %v855_v55 = vmul.f32 %v823_v25, %v823_v25 }
 0x174   :  { %vm2429_vm11 = vmand %vm2681_vm8, %vm629_vm6  ;;  %vm2688_vm12 = vnez %v2658_v47  ;;  %v884_v9 = vadd.f32 %v868_v46, %v836_v16 }
 0x175   :  { %vm2437_vm9 = vmxor %vm630_vm10, %vm2583_vm3  ;;  %v897_v13 = vadd.f32 %v896_v20, %v882_v53  ;;  %v837_v11 = vsel %vm2429_vm11, %v1795_v54, 0.0 }
 0x176   :  { %vm677_vm1 = vmand %vm2681_vm8, %vm2413_vm13 }
 0x177   :  { %vm663_vm15 = vmxor %vm631_vm2, %vm2583_vm3  ;;  %v869_v6 = vsel %vm677_vm1, %v853_v36, 0.0  ;;  %v898_v29 = vadd.f32 %v897_v13, %v883_v61  ;;  %vm2689_vm3 = vnez %v2670_v52 }
 0x178   :  { %vm678_vm4 = vmand %vm2688_vm12, %vm2437_vm9  ;;  %v885_v49 = vadd.f32 %v869_v6, %v837_v11 }
 0x179   :  { %vm646_vm14 = vmand %vm2688_vm12, %vm630_vm10  ;;  %v870_v21 = vsel %vm678_vm4, %v854_v4, 0.0  ;;  %v899_v23 = vadd.f32 %v898_v29, %v884_v9 }
 0x17a   :  { %vm679_vm5 = vmand %vm2689_vm3, %vm663_vm15  ;;  %v838_v34 = vsel %vm646_vm14, %v1860_v32, 0.0 }
 0x17b   :  { %v871_v31 = vsel %vm679_vm5, %v855_v55, 0.0  ;;  %vm647_vm6 = vmand %vm2689_vm3, %vm631_vm2  ;;  %v886_v33 = vadd.f32 %v870_v21, %v838_v34  ;;  %v900_v38 = vadd.f32 %v899_v23, %v885_v49 }
 0x17c   :  { %v839_v60 = vsel %vm647_vm6, %v1854_v28, 0.0 }
 0x17d   :  { %v887_v40 = vadd.f32 %v871_v31, %v839_v60  ;;  %v901_v54 = vadd.f32 %v900_v38, %v886_v33 }
 0x17f   :  { %v902_v5 = vadd.f32 %v901_v54, %v887_v40 }
 0x181   :  { %903 = vadd.xlane.f32.xlu0 %v902_v5 }
 0x20e   :  { %v904_v43 = vpop.xlane.xlu0 %903 }
 0x20f   :  { %v905_v17 = vrot.slane %v904_v43, 4 }
 0x211   :  { %v906_v47 = vadd.f32 %v905_v17, %v904_v43 }
 0x213   :  { %v907_v39 = vrot.slane %v906_v47, 2 }
 0x215   :  { %v908_v50 = vadd.f32 %v907_v39, %v906_v47 }
 0x217   :  { %v909_v32 = vrot.slane %v908_v50, 1 }
 0x219   :  { %v910_v0 = vadd.f32 %v909_v32, %v908_v50 }
 0x21b   :  { %1116 = vpush %v910_v0 }
 0x24c   :  { %s1117_s27 = spop %1116 }
 0x24d   :  { %v913_v15 = vstv %s1117_s27 }
 0x24e   :  { %915 = vst [vmem:[#allocation2] sm:$0xff] %v913_v15 }
 0x24f   :  { %1167 = shalt.err (!%p1164_p4)
}
 0x250   :  { %s1168_s29 = scalar_lea.hbm %s2496_s6, 128 }
 0x251   :  { %p1169_p5 = scmp.ne.s32.totalorder %s2496_s6, %s1168_s29  ;;  %p1172_p6 = scmp.lt.u32.totalorder %s1168_s29, %s2496_s6 }
 0x253   :  { %p1174_p7 = pnand %p1172_p6, %p1169_p5 }
 0x255   :  { %1177 = shalt.err (!%p1174_p7)
}
 0x256   :  { %925 = dma.vmem_to_hbm [thread:$0]  %s923_s26, 128, %s2496_s6, [#allocation3]  }
 0x257   :  { %1178 = dma.done.wait [#allocation3], 128  }
 0x258   :  { %1179 = vsyncadd [#allocation3], 4294967168 }
 0x259   :  { %929 = vsyncpa [#allocation3], 1 }

</bundles_post_ra>
